<compile_context>
chip_gen: v6e
topology: v6e:2x2x1
jax: 0.10.0
libtpu: 0.0.40
codegen_flags: <defaults>
</compile_context>

<pallas_src>
import jax
import jax.numpy as jnp
from jax.experimental import pallas as pl
from jax.experimental.pallas import tpu as pltpu  # noqa: F401  (TPU backend)

BN_EPS = 1e-5
IN_F = 879        # fc1 input features
HID = 10          # fc1 output features / BN width
K_PAD = 896       # 879 padded to 7 * 128 (lane-aligned contraction dim)
HID_PAD = 16      # 10 padded to 16 (sublane-aligned hidden dim)
OUT_PAD = 128     # lane-dense output tile; real output is column 0


def simplenet_kernel(x_ref, w1t_ref, p_ref, out_ref):
    # fc1 (bias omitted -- cancelled by BN batch-mean subtraction).
    # w1t is the (HID_PAD, K_PAD) transpose of w1; contract both operands on
    # their last (896) dim so the transpose is handled at MXU feed time.
    x = x_ref[...]                                               # (B, 896)
    h = jax.lax.dot_general(
        x, w1t_ref[...],
        dimension_numbers=(((1,), (1,)), ((), ())),
        preferred_element_type=jnp.float32)                      # (B, 16)

    # Training-mode BatchNorm1d, two-pass moments, folded to scale + beta.
    inv_b = 1.0 / h.shape[0]
    mean = jnp.sum(h, axis=0, keepdims=True) * inv_b             # (1, 16)
    centered = h - mean
    var = jnp.sum(centered * centered, axis=0, keepdims=True) * inv_b

    gamma = p_ref[0:1, :]
    beta = p_ref[1:2, :]
    scale = gamma * jax.lax.rsqrt(var + BN_EPS)                  # (1, 16)

    # Padded hidden columns: h==0, centered==0, gamma==0 -> a==0.5, and the
    # padded w2 lanes are 0, so they contribute nothing to fc2.
    a = jax.nn.sigmoid(centered * scale + beta)                  # (B, 16)

    # fc2 on VPU + XLU lane reduce: y = a . w2 + b2
    w2_row = p_ref[2:3, :]                                       # (1, 16)
    b2 = p_ref[3:4, 0:1]                                         # (1, 1)
    y = jnp.sum(a * w2_row, axis=1, keepdims=True) + b2          # (B, 1)

    # Lane-dense store: broadcast across the 128-lane tile -> unmasked vst.
    out_ref[...] = jnp.broadcast_to(jax.nn.sigmoid(y), out_ref.shape)


def pack_params(params):
    """One-time packing: w1 as a 56 KiB sublane-padded transpose + a tiny
    (4, 16) slab holding gamma / beta / w2 / b2.  Call ONCE at init and keep
    the results as device arrays; do not call per step."""
    w1, b1, gamma, beta, w2, b2 = params
    del b1  # cancelled exactly by training-mode BN mean subtraction
    w1t = jnp.zeros((HID_PAD, K_PAD), jnp.float32).at[:HID, :IN_F].set(w1.T)
    p = jnp.zeros((4, HID_PAD), jnp.float32)
    p = p.at[0, :HID].set(gamma.reshape(-1))
    p = p.at[1, :HID].set(beta.reshape(-1))
    p = p.at[2, :HID].set(w2.reshape(-1))
    p = p.at[3, 0].set(b2.reshape(-1)[0])
    return w1t, p


@jax.jit
def simplenet_forward(x, w1t, p):
    """Per-step forward: pad x (tiny at small B, fused under jit), one
    pallas_call, slice the lane-dense output back to (B, 1)."""
    B = x.shape[0]
    xp = jnp.pad(x, ((0, 0), (0, K_PAD - IN_F)))                 # (B, 896)

    full = lambda arr: pl.BlockSpec(arr.shape, lambda: (0,) * arr.ndim)
    out = pl.pallas_call(
        simplenet_kernel,
        out_shape=jax.ShapeDtypeStruct((B, OUT_PAD), jnp.float32),
        in_specs=[full(xp), full(w1t), full(p)],
        out_specs=pl.BlockSpec((B, OUT_PAD), lambda: (0, 0)),
    )(xp, w1t, p)
    return out[:, :1]


def init_params(key):
    # Mirror nn.Linear's U(-1/sqrt(fan_in), 1/sqrt(fan_in)) and BatchNorm1d's
    # (gamma=1, beta=0) defaults.  b1 is created only for the reference.
    k1, k2, k3, k4 = jax.random.split(key, 4)
    bound1 = 1.0 / jnp.sqrt(float(IN_F))
    w1 = jax.random.uniform(k1, (IN_F, HID), jnp.float32, -bound1, bound1)
    b1 = jax.random.uniform(k2, (1, HID), jnp.float32, -bound1, bound1)
    gamma = jnp.ones((1, HID), jnp.float32)
    beta = jnp.zeros((1, HID), jnp.float32)
    bound2 = 1.0 / jnp.sqrt(float(HID))
    w2 = jax.random.uniform(k3, (HID, 1), jnp.float32, -bound2, bound2)
    b2 = jax.random.uniform(k4, (1, 1), jnp.float32, -bound2, bound2)
    return (w1, b1, gamma, beta, w2, b2)


def reference_forward(x, params):
    # Pure-JAX reference matching the PyTorch module exactly (including b1),
    # which also validates that dropping b1 in the kernel is lossless.
    w1, b1, gamma, beta, w2, b2 = params
    h = x @ w1 + b1
    mean = jnp.mean(h, axis=0, keepdims=True)
    var = jnp.mean((h - mean) ** 2, axis=0, keepdims=True)
    hn = (h - mean) / jnp.sqrt(var + BN_EPS) * gamma + beta
    a = jax.nn.sigmoid(hn)
    return jax.nn.sigmoid(a @ w2 + b2)


if __name__ == "__main__":
    key = jax.random.PRNGKey(0)
    kx, kp = jax.random.split(key)
    B = 8  # BatchNorm1d (training mode) needs B >= 2
    x = jax.random.normal(kx, (B, IN_F), jnp.float32)
    params = init_params(kp)

    # Pack once at init; only x pad + pallas_call run per step (jitted).
    w1t, p = jax.block_until_ready(pack_params(params))

    out = simplenet_forward(x, w1t, p)
    out = jax.block_until_ready(out)

    ref = reference_forward(x, params)
    assert out.shape == (B, 1)
    assert jnp.allclose(out, ref, atol=1e-5, rtol=1e-5)
    # TODO(synk): BatchNorm1d running_mean/running_var buffer updates (training
    # side effect) are not emitted; forward output parity is exact without them.
    print("KERNEL_OK")
</pallas_src>

<mosaic_0001>
module attributes {stable_mosaic.version = 11 : i64} {
  func.func @simplenet_kernel(%arg0: memref<8x896xf32, #tpu.memory_space<vmem>>, %arg1: memref<16x896xf32, #tpu.memory_space<vmem>>, %arg2: memref<4x16xf32, #tpu.memory_space<vmem>>, %arg3: memref<8x128xf32, #tpu.memory_space<vmem>>) attributes {dimension_semantics = [], scalar_prefetch = 0 : i64, scratch_operands = 0 : i64, tpu.core_type = #tpu.core_type<tc>} {
    %c0 = arith.constant 0 : index
    %c0_0 = arith.constant 0 : index
    %0 = vector.load %arg0[%c0, %c0_0] : memref<8x896xf32, #tpu.memory_space<vmem>>, vector<8x896xf32>
    %c0_1 = arith.constant 0 : index
    %c0_2 = arith.constant 0 : index
    %1 = vector.load %arg1[%c0_1, %c0_2] : memref<16x896xf32, #tpu.memory_space<vmem>>, vector<16x896xf32>
    %cst = arith.constant dense<0.000000e+00> : vector<8x16xf32>
    %2 = tpu.matmul %0, %1, %cst {dimension_numbers = #tpu.dot_dimension_numbers<[1], [1], [0], [0], [0, 0, 1, 0], [], []>} : vector<8x896xf32>, vector<16x896xf32>, vector<8x16xf32> -> vector<8x16xf32>
    %cst_3 = arith.constant dense<0.000000e+00> : vector<16xf32>
    %3 = vector.multi_reduction <add>, %2, %cst_3 [0] : vector<8x16xf32> to vector<16xf32>
    %4 = vector.shape_cast %3 : vector<16xf32> to vector<1x16xf32>
    %cst_4 = arith.constant 1.250000e-01 : f32
    %5 = vector.broadcast %cst_4 : f32 to vector<1x16xf32>
    %6 = arith.mulf %4, %5 : vector<1x16xf32>
    %7 = vector.broadcast %6 : vector<1x16xf32> to vector<8x16xf32>
    %8 = arith.subf %2, %7 : vector<8x16xf32>
    %9 = arith.mulf %8, %8 : vector<8x16xf32>
    %cst_5 = arith.constant dense<0.000000e+00> : vector<16xf32>
    %10 = vector.multi_reduction <add>, %9, %cst_5 [0] : vector<8x16xf32> to vector<16xf32>
    %11 = vector.shape_cast %10 : vector<16xf32> to vector<1x16xf32>
    %cst_6 = arith.constant 1.250000e-01 : f32
    %12 = vector.broadcast %cst_6 : f32 to vector<1x16xf32>
    %13 = arith.mulf %11, %12 : vector<1x16xf32>
    %c0_7 = arith.constant 0 : index
    %c0_8 = arith.constant 0 : index
    %14 = vector.load %arg2[%c0_7, %c0_8] : memref<4x16xf32, #tpu.memory_space<vmem>>, vector<1x16xf32>
    %c1 = arith.constant 1 : index
    %c0_9 = arith.constant 0 : index
    %15 = vector.load %arg2[%c1, %c0_9] : memref<4x16xf32, #tpu.memory_space<vmem>>, vector<1x16xf32>
    %cst_10 = arith.constant 9.99999974E-6 : f32
    %16 = vector.broadcast %cst_10 : f32 to vector<1x16xf32>
    %17 = arith.addf %13, %16 : vector<1x16xf32>
    %18 = math.rsqrt %17 : vector<1x16xf32>
    %19 = arith.mulf %14, %18 : vector<1x16xf32>
    %20 = vector.broadcast %19 : vector<1x16xf32> to vector<8x16xf32>
    %21 = arith.mulf %8, %20 : vector<8x16xf32>
    %22 = vector.broadcast %15 : vector<1x16xf32> to vector<8x16xf32>
    %23 = arith.addf %21, %22 : vector<8x16xf32>
    %24 = arith.negf %23 : vector<8x16xf32>
    %25 = math.exp %24 : vector<8x16xf32>
    %cst_11 = arith.constant 1.000000e+00 : f32
    %26 = vector.broadcast %cst_11 : f32 to vector<8x16xf32>
    %27 = arith.addf %26, %25 : vector<8x16xf32>
    %28 = arith.divf %26, %27 : vector<8x16xf32>
    %c2 = arith.constant 2 : index
    %c0_12 = arith.constant 0 : index
    %29 = vector.load %arg2[%c2, %c0_12] : memref<4x16xf32, #tpu.memory_space<vmem>>, vector<1x16xf32>
    %c3 = arith.constant 3 : index
    %c0_13 = arith.constant 0 : index
    %30 = vector.load %arg2[%c3, %c0_13] : memref<4x16xf32, #tpu.memory_space<vmem>>, vector<1x1xf32>
    %31 = vector.broadcast %29 : vector<1x16xf32> to vector<8x16xf32>
    %32 = arith.mulf %28, %31 : vector<8x16xf32>
    %cst_14 = arith.constant dense<0.000000e+00> : vector<8xf32>
    %33 = vector.multi_reduction <add>, %32, %cst_14 [1] : vector<8x16xf32> to vector<8xf32>
    %34 = vector.shape_cast %33 : vector<8xf32> to vector<8x1xf32>
    %35 = vector.broadcast %30 : vector<1x1xf32> to vector<8x1xf32>
    %36 = arith.addf %34, %35 : vector<8x1xf32>
    %37 = arith.negf %36 : vector<8x1xf32>
    %38 = math.exp %37 : vector<8x1xf32>
    %cst_15 = arith.constant 1.000000e+00 : f32
    %39 = vector.broadcast %cst_15 : f32 to vector<8x1xf32>
    %40 = arith.addf %39, %38 : vector<8x1xf32>
    %41 = arith.divf %39, %40 : vector<8x1xf32>
    %42 = vector.shape_cast %41 : vector<8x1xf32> to vector<8x1xf32>
    %43 = vector.broadcast %42 : vector<8x1xf32> to vector<8x128xf32>
    %c0_16 = arith.constant 0 : index
    %c0_17 = arith.constant 0 : index
    %44 = vector.load %arg3[%c0_16, %c0_17] : memref<8x128xf32, #tpu.memory_space<vmem>>, vector<8x128xf32>
    tpu.vector_store %arg3[%c0_16, %c0_17], %43 {strides = array<i32>} : memref<8x128xf32, #tpu.memory_space<vmem>>, vector<8x128xf32>,
    return
  }
}

</mosaic_0001>

<bundles_post_ra>
// kernel: simplenet_forward.1
= control target key start
LH: loop header
LB: loop body
LE: loop exit
PB: predicated region body
PF: predicated region fallthrough
CT: control target
= control target key end

     0   :  { %v415_v13 = vmov 0.0   ;;  %vm416_vm0 = vmmov 0   ;;  %vm315_vm1 = vcmask 130048   ;;  %v339_v52 = vlaneseq  ;;  %s519_s1 = inlined_call_operand.vmem [shape: f32[16,896], index: 1, kind: input, shape index: {}]   ;;  %s520_s0 = inlined_call_operand.vmem [shape: f32[8,896], index: 0, kind: input, shape index: {}]   ;;  %s521_s2 = inlined_call_operand.vmem [shape: f32[4,16], index: 2, kind: input, shape index: {}]   ;;  %s522_s3 = inlined_call_operand.vmem [shape: f32[8,128], index: 3, kind: output, shape index: {}]  }
   0x1   :  { %v29_v0 = vld [vmem:[%s519_s1 + $0x40] sm:$0xff]  ;;  %v31_v1 = vld [vmem:[%s519_s1 + $0x50] sm:$0xff]  ;;  %v28_v2 = vld [vmem:[%s519_s1 + $0x38] sm:$0xff] }
   0x2   :  { %63 = vmatprep.subr.mxu0 %v29_v0  ;;  %133 = vmatprep.subr.mxu1 %v31_v1  ;;  %v30_v3 = vld [vmem:[%s519_s1 + $0x48] sm:$0xff]  ;;  %v24_v5 = vld [vmem:[%s519_s1 + $0x18] sm:$0xff]  ;;  %v21_v7 = vld [vmem:[%s519_s1] sm:$0xff]  ;;  %v340_v53 = vshrl.u32 %v339_v52, 7 }
   0x3   :  { %v22_v4 = vld [vmem:[%s519_s1 + $0x8] sm:$0xff]  ;;  %64 = vmatpush1.xpose.msra.mxu0 %v28_v2  ;;  %134 = vmatpush1.xpose.msra.mxu1 %v30_v3  ;;  %v23_v8 = vld [vmem:[%s519_s1 + $0x10] sm:$0xff]  ;;  %v17_v9 = vld [vmem:[%s520_s0 + $0x18] sm:$0xff] }
   0x4   :  { %v15_v6 = vld [vmem:[%s520_s0 + $0x8] sm:$0xff]  ;;  %65 = vmatprep.subr.mxu0 %v22_v4  ;;  %135 = vmatprep.subr.mxu1 %v24_v5  ;;  %v33_v10 = vld [vmem:[%s519_s1 + $0x60] sm:$0xff]  ;;  %v16_v12 = vld [vmem:[%s520_s0 + $0x10] sm:$0xff]  ;;  %v341_v55 = vsub.s32 0, %v340_v53  ;;  %v417_v5 = vmov 0  }
   0x5   :  { %99 = vmatprep.mubr.f32.mxu0 %v15_v6  ;;  %169 = vmatprep.mubr.f32.mxu1 %v17_v9  ;;  %v14_v11 = vld [vmem:[%s520_s0] sm:$0xff]  ;;  %v32_v14 = vld [vmem:[%s519_s1 + $0x58] sm:$0xff]  ;;  %v34_v15 = vld [vmem:[%s519_s1 + $0x68] sm:$0xff] }
   0x6   :  { %v26_v16 = vld [vmem:[%s519_s1 + $0x28] sm:$0xff]  ;;  %v25_v18 = vld [vmem:[%s519_s1 + $0x20] sm:$0xff]  ;;  %v27_v19 = vld [vmem:[%s519_s1 + $0x30] sm:$0xff]  ;;  %404 = vset.pattern.permute.xlu0 %v417_v5 }
   0x7   :  { %66 = vmatpush1.xpose.msra.mxu0 %v21_v7  ;;  %136 = vmatpush1.xpose.msra.mxu1 %v23_v8  ;;  %v19_v17 = vld [vmem:[%s520_s0 + $0x28] sm:$0xff]  ;;  %v18_v20 = vld [vmem:[%s520_s0 + $0x20] sm:$0xff]  ;;  %v20_v21 = vld [vmem:[%s520_s0 + $0x30] sm:$0xff] }
   0x8   :  { %203 = vmatprep.subr.mxu0 %v33_v10  ;;  %394 = vmatprep.subr.mxu1 %v415_v13  ;;  %v334_v54 = vld [vmem:[%s521_s2] sm:$0x1]  ;;  %v386_v59 = vld [vmem:[%s521_s2 + $0x1] ss:$0 sm:$0xff]  ;;  %v388_v1 = vld [vmem:[%s521_s2 + $0x2] ss:$0 sm:$0xff] }
   0x9   :  { %v389_v6 = vld [vmem:[%s521_s2 + $0x3] ss:$0 sm:$0xff] }
   0xa   :  { %100 = vmatmul.mubr.f32.vlgmr.msra.gmra.mxu0 %v14_v11  ;;  %170 = vmatmul.mubr.f32.vlgmr.msra.gmra.mxu1 %v16_v12 }
   0xb   :  { %204 = vmatpush1.xpose.msra.mxu0 %v32_v14  ;;  %395 = vmatpush3.xpose.msra.mxu1 %v34_v15 }
   0xc   :  { %205 = vmatprep.subr.mxu0 %v26_v16  ;;  %396 = vmatprep.subr.mxu1 %v415_v13 }
   0xd   :  { %239 = vmatprep.mubr.f32.mxu0 %v19_v17  ;;  %398 = vmatprep.mubr.msk.f32.mxu1 %vm416_vm0, %v415_v13 }
   0xf   :  { %206 = vmatpush1.xpose.msra.mxu0 %v25_v18  ;;  %397 = vmatpush3.xpose.msra.mxu1 %v27_v19 }
  0x12   :  { %240 = vmatmul.mubr.f32.vlgmr.msra.gmra.mxu0 %v18_v20  ;;  %399 = vmatmul.mubr.f32.vlgmr.msra.gmra.mxu1 %v20_v21 }
  0xca   :  { %v101_v22 = vpop.f32.mrf.mxu0  ;;  %v171_v23 = vpop.f32.mrf.mxu1 }
  0xcb   :  { %v172_v26 = vadd.f32 %v171_v23, %v101_v22 }
  0xcc   :  { %v103_v24 = vpop.f32.mrf.mxu0  ;;  %v173_v25 = vpop.f32.mrf.mxu1 }
  0xd2   :  { %v241_v27 = vpop.f32.mrf.mxu0  ;;  %v311_v28 = vpop.f32.mrf.mxu1 }
  0xd3   :  { %v242_v29 = vadd.f32 %v241_v27, %v172_v26 }
  0xd4   :  { %v243_v30 = vpop.f32.mrf.mxu0  ;;  %v400_v31 = vpop.f32.mrf.mxu1 }
  0xd5   :  { %v312_v32 = vadd.f32 %v311_v28, %v242_v29 }
  0xd7   :  { %v316_v33 = vsel %vm315_vm1, %v312_v32, 0.0 }
  0xd8   :  { %v317_v34 = vrot.slane %v316_v33, 4 }
  0xda   :  { %v318_v35 = vadd.f32 %v317_v34, %v316_v33 }
  0xdc   :  { %v319_v36 = vrot.slane %v318_v35, 2 }
  0xde   :  { %v320_v37 = vadd.f32 %v319_v36, %v318_v35 }
  0xe0   :  { %v321_v38 = vrot.slane %v320_v37, 1 }
  0xe2   :  { %v322_v39 = vadd.f32 %v321_v38, %v320_v37 }
  0xe4   :  { %v323_v40 = vmul.f32 0.125, %v322_v39 }
  0xe6   :  { %v324_v41 = vsub.f32 %v312_v32, %v323_v40 }
  0xe8   :  { %v325_v42 = vmul.f32 %v324_v41, %v324_v41 }
  0xea   :  { %v326_v43 = vsel %vm315_vm1, %v325_v42, 0.0 }
  0xeb   :  { %v327_v44 = vrot.slane %v326_v43, 4 }
  0xed   :  { %v328_v45 = vadd.f32 %v327_v44, %v326_v43 }
  0xef   :  { %v329_v46 = vrot.slane %v328_v45, 2 }
  0xf1   :  { %v330_v47 = vadd.f32 %v329_v46, %v328_v45 }
  0xf3   :  { %v331_v48 = vrot.slane %v330_v47, 1 }
  0xf5   :  { %v332_v49 = vadd.f32 %v331_v48, %v330_v47 }
  0xf7   :  { %v333_v50 = vmul.f32 0.125, %v332_v49 }
  0xf9   :  { %v336_v51 = vadd.f32 1e-05, %v333_v50 }
  0xfb   :  { %405 = vrsqrt.f32 %v336_v51 }
 0x108   :  { %v406_v56 = vpop.eup %405 }
 0x109   :  { %v338_v57 = vmul.f32 %v406_v56, %v334_v54 }
 0x10b   :  { %v342_v58 = vrot.slane %v338_v57, %v341_v55 }
 0x10d   :  { %v343_v60 = vmul.f32 %v342_v58, %v324_v41 }
 0x10f   :  { %v348_v61 = vadd.f32 %v386_v59, %v343_v60 }
 0x111   :  { %v387_v62 = vmul.f32 -1.442695, %v348_v61 }
 0x113   :  { %407 = vpow2.f32 %v387_v62 }
 0x120   :  { %v408_v63 = vpop.eup %407 }
 0x121   :  { %v352_v0 = vadd.f32 1.0, %v408_v63 }
 0x123   :  { %409 = vrcp.f32 %v352_v0 }
 0x130   :  { %v410_v2 = vpop.eup %409 }
 0x131   :  { %v361_v3 = vmul.f32 %v410_v2, %v388_v1 }
 0x133   :  { %v362_v4 = vsel %vm315_vm1, %v361_v3, 0.0 }
 0x134   :  { %363 = vadd.xlane.f32.xlu0 %v362_v4 }
 0x1bd   :  { %v364_v7 = vpop.xlane.xlu0 %363 }
 0x1be   :  { %v369_v8 = vadd.f32 %v389_v6, %v364_v7 }
 0x1c0   :  { %v390_v9 = vmul.f32 -1.442695, %v369_v8 }
 0x1c2   :  { %411 = vpow2.f32 %v390_v9 }
 0x1cf   :  { %v412_v10 = vpop.eup %411 }
 0x1d0   :  { %v373_v11 = vadd.f32 1.0, %v412_v10 }
 0x1d2   :  { %413 = vrcp.f32 %v373_v11 }
 0x1df   :  { %v414_v12 = vpop.eup %413 }
 0x1e0   :  { %378 = vperm.xlu0 %404, %v414_v12  }
 0x25b   :  { %v379_v13 = vpop.permute.xlu0 %378 }
 0x25c   :  { %381 = vst [vmem:[%s522_s3] sm:$0xff] %v379_v13 }

</bundles_post_ra>
